<compile_context>
chip_gen: v7x
topology: tpu7x:2x2x1
jax: 0.10.0
libtpu: 0.0.40
codegen_flags: <defaults>
</compile_context>

<pallas_src>
import functools

import jax
import jax.numpy as jnp
from jax.experimental import pallas as pl
from jax.experimental.pallas import tpu as pltpu


# ----------------------------------------------------------------------------
# Kernel A: ConvTranspose2d(kernel=2, stride=2) fused with depth-to-space.
# One dot per image against a (Cin, 4*Cup) weight; columns ordered (kh, kw, co).
# Output layout (N, h, kh, w, kw*Cup) so the reshape to (N, 2h, 2w, Cup) is a
# pure adjacent-dim merge (free).
# ----------------------------------------------------------------------------
def _upconv_kernel(x_ref, w_ref, b_ref, o_ref):
    h, w, Cin = x_ref.shape
    Cup2 = o_ref.shape[-1]
    x = x_ref[...].reshape(h * w, Cin)                               # bf16
    y = jnp.dot(x, w_ref[...], preferred_element_type=jnp.float32)  # (h*w, 4*Cup)
    y = y + b_ref[...]
    o_ref[:, 0:1, :, :] = y[:, :Cup2].reshape(h, 1, w, Cup2).astype(o_ref.dtype)
    o_ref[:, 1:2, :, :] = y[:, Cup2:].reshape(h, 1, w, Cup2).astype(o_ref.dtype)


def upconv_pixelshuffle(x_nhwc, up_w, up_b):
    """x: (N,h,w,Cin) bf16. up_w: PyTorch layout (Cin, Cup, 2, 2). up_b: (Cup,)."""
    N, h, w, Cin = x_nhwc.shape
    Cup = up_w.shape[1]
    Cup2, Cup4 = 2 * Cup, 4 * Cup
    # (Cin, Cup, kh, kw) -> (Cin, kh, kw, Cup) -> (Cin, 4*Cup); columns = (kh, kw, co)
    w_k = jnp.transpose(up_w, (0, 2, 3, 1)).reshape(Cin, Cup4).astype(jnp.bfloat16)
    b_k = jnp.tile(up_b, 4).reshape(1, Cup4).astype(jnp.float32)
    y6 = pl.pallas_call(
        _upconv_kernel,
        out_shape=jax.ShapeDtypeStruct((N, h, 2, w, Cup2), jnp.bfloat16),
        grid=(N,),
        in_specs=[
            pl.BlockSpec((None, h, w, Cin), lambda n: (n, 0, 0, 0)),
            pl.BlockSpec((Cin, Cup4), lambda n: (0, 0)),
            pl.BlockSpec((1, Cup4), lambda n: (0, 0)),
        ],
        out_specs=pl.BlockSpec((None, h, 2, w, Cup2), lambda n: (n, 0, 0, 0, 0)),
        compiler_params=pltpu.CompilerParams(dimension_semantics=("parallel",)),
    )(x_nhwc, w_k, b_k)
    # free reshape: (N, h, kh, w, kw*Cup) -> (N, 2h, 2w, Cup)
    return y6.reshape(N, 2 * h, 2 * w, Cup)


# ----------------------------------------------------------------------------
# Kernel B: conv1 = 3x3 dilated conv over [upsampled ++ skip].  The concat and
# the d-wide zero halo are built in a bf16 VMEM scratch (never hit HBM); each
# tap is a single bf16 dot accumulated in registers; bias + ReLU in f32; BN
# sum / sum-of-squares accumulated across the batch ("arbitrary") grid axis.
# ----------------------------------------------------------------------------
def _conv1_kernel(y_ref, s_in_ref, w_ref, b_ref,
                  o_ref, sum_ref, sq_ref, xb_ref, *, H, W, d):
    @pl.when(pl.program_id(0) == 0)
    def _():
        sum_ref[...] = jnp.zeros_like(sum_ref)
        sq_ref[...] = jnp.zeros_like(sq_ref)
        xb_ref[...] = jnp.zeros_like(xb_ref)   # halo stays zero on later steps

    C = xb_ref.shape[-1]
    # in-VMEM "concat" of [upsampled, skip] on the channel axis (interior only)
    xb_ref[d:d + H, d:d + W, :] = jnp.concatenate(
        [y_ref[...], s_in_ref[...]], axis=-1)

    acc = None
    for kh in range(3):
        for kw in range(3):
            patch = xb_ref[kh * d:kh * d + H, kw * d:kw * d + W, :].reshape(H * W, C)
            t = jnp.dot(patch, w_ref[kh, kw], preferred_element_type=jnp.float32)
            acc = t if acc is None else acc + t
    act = jnp.maximum(acc + b_ref[...], 0.0)                 # bias + ReLU (f32)
    o_ref[...] = act.reshape(H, W, -1).astype(o_ref.dtype)   # bf16 out
    sum_ref[...] += jnp.sum(act, axis=0, keepdims=True)
    sq_ref[...] += jnp.sum(act * act, axis=0, keepdims=True)


def conv1_fused(y, skip, w, b, *, d):
    N, H, W, Cy = y.shape
    Cs = skip.shape[-1]
    C = Cy + Cs
    Cout = w.shape[-1]
    Hp, Wp = H + 2 * d, W + 2 * d
    kernel = functools.partial(_conv1_kernel, H=H, W=W, d=d)
    y1, s, ss = pl.pallas_call(
        kernel,
        out_shape=(
            jax.ShapeDtypeStruct((N, H, W, Cout), jnp.bfloat16),
            jax.ShapeDtypeStruct((1, Cout), jnp.float32),
            jax.ShapeDtypeStruct((1, Cout), jnp.float32),
        ),
        grid=(N,),
        in_specs=[
            pl.BlockSpec((None, H, W, Cy), lambda n: (n, 0, 0, 0)),
            pl.BlockSpec((None, H, W, Cs), lambda n: (n, 0, 0, 0)),
            pl.BlockSpec((3, 3, C, Cout), lambda n: (0, 0, 0, 0)),
            pl.BlockSpec((1, Cout), lambda n: (0, 0)),
        ],
        out_specs=(
            pl.BlockSpec((None, H, W, Cout), lambda n: (n, 0, 0, 0)),
            pl.BlockSpec((1, Cout), lambda n: (0, 0)),
            pl.BlockSpec((1, Cout), lambda n: (0, 0)),
        ),
        scratch_shapes=[pltpu.VMEM((Hp, Wp, C), jnp.bfloat16)],
        compiler_params=pltpu.CompilerParams(dimension_semantics=("arbitrary",)),
    )(y, skip, w, b)
    return y1, s, ss


# ----------------------------------------------------------------------------
# Kernel C: conv2 = [conv1's BN scale/shift applied in f32, written once into
# the bf16 padded scratch interior; halo stays zero] -> 3x3 dilated conv ->
# bias -> ReLU, with BN-stat accumulation for conv2's own BatchNorm.
# ----------------------------------------------------------------------------
def _conv2_kernel(x_ref, sc_ref, sh_ref, w_ref, b_ref,
                  o_ref, sum_ref, sq_ref, xb_ref, *, H, W, d):
    @pl.when(pl.program_id(0) == 0)
    def _():
        sum_ref[...] = jnp.zeros_like(sum_ref)
        sq_ref[...] = jnp.zeros_like(sq_ref)
        xb_ref[...] = jnp.zeros_like(xb_ref)   # halo stays zero on later steps

    C = xb_ref.shape[-1]
    # BN1 affine on the interior (f32 math, single bf16 store); the zero halo
    # matches zero-padding the normalized tensor in the reference.
    xn = x_ref[...].astype(jnp.float32) * sc_ref[...] + sh_ref[...]
    xb_ref[d:d + H, d:d + W, :] = xn.astype(xb_ref.dtype)

    acc = None
    for kh in range(3):
        for kw in range(3):
            patch = xb_ref[kh * d:kh * d + H, kw * d:kw * d + W, :].reshape(H * W, C)
            t = jnp.dot(patch, w_ref[kh, kw], preferred_element_type=jnp.float32)
            acc = t if acc is None else acc + t
    act = jnp.maximum(acc + b_ref[...], 0.0)
    o_ref[...] = act.reshape(H, W, -1).astype(o_ref.dtype)
    sum_ref[...] += jnp.sum(act, axis=0, keepdims=True)
    sq_ref[...] += jnp.sum(act * act, axis=0, keepdims=True)


def conv2_fused(x, scale_in, shift_in, w, b, *, d):
    N, H, W, Cin = x.shape
    Cout = w.shape[-1]
    Hp, Wp = H + 2 * d, W + 2 * d
    kernel = functools.partial(_conv2_kernel, H=H, W=W, d=d)
    y2, s, ss = pl.pallas_call(
        kernel,
        out_shape=(
            jax.ShapeDtypeStruct((N, H, W, Cout), jnp.float32),
            jax.ShapeDtypeStruct((1, Cout), jnp.float32),
            jax.ShapeDtypeStruct((1, Cout), jnp.float32),
        ),
        grid=(N,),
        in_specs=[
            pl.BlockSpec((None, H, W, Cin), lambda n: (n, 0, 0, 0)),
            pl.BlockSpec((1, Cin), lambda n: (0, 0)),
            pl.BlockSpec((1, Cin), lambda n: (0, 0)),
            pl.BlockSpec((3, 3, Cin, Cout), lambda n: (0, 0, 0, 0)),
            pl.BlockSpec((1, Cout), lambda n: (0, 0)),
        ],
        out_specs=(
            pl.BlockSpec((None, H, W, Cout), lambda n: (n, 0, 0, 0)),
            pl.BlockSpec((1, Cout), lambda n: (0, 0)),
            pl.BlockSpec((1, Cout), lambda n: (0, 0)),
        ),
        scratch_shapes=[pltpu.VMEM((Hp, Wp, Cin), jnp.bfloat16)],
        compiler_params=pltpu.CompilerParams(dimension_semantics=("arbitrary",)),
    )(x, scale_in, shift_in, w, b)
    return y2, s, ss


# ----------------------------------------------------------------------------
# BatchNorm (training-mode) scale/shift from accumulated sum / sum-of-squares.
# NOTE: E[x^2]-E[x]^2 in f32 can cancel for large-mean activations; fine at
# these scales (post-ReLU, O(1) activations).  A Welford pass is safer at scale.
# ----------------------------------------------------------------------------
def bn_scale_shift(s, ss, gamma, beta, count, eps=1e-5):
    mean = s / count
    var = jnp.maximum(ss / count - mean * mean, 0.0)
    scale = gamma.reshape(1, -1) / jnp.sqrt(var + eps)
    shift = beta.reshape(1, -1) - mean * scale
    return scale, shift                       # both (1, C) f32


# ----------------------------------------------------------------------------
# ConvUpBlock forward
# ----------------------------------------------------------------------------
def conv_up_block_forward(params, x_nchw, x_skip_nchw, dilation=1):
    d = dilation
    x = jnp.transpose(x_nchw, (0, 2, 3, 1)).astype(jnp.bfloat16)        # NCHW->NHWC
    x_skip = jnp.transpose(x_skip_nchw, (0, 2, 3, 1)).astype(jnp.bfloat16)
    N, h, w, Cin = x.shape

    # --- ConvTranspose2d(Cin, Cin//2, 2, stride=2) fused with depth-to-space ---
    y = upconv_pixelshuffle(x, params["up_w"], params["up_b"])          # (N,2h,2w,Cup) bf16
    H, W = 2 * h, 2 * w

    # --- reflect-pad skip (bottom/right) to (H, W); channel order is [up, skip] ---
    H_diff, W_diff = H - x_skip.shape[1], W - x_skip.shape[2]
    assert 0 <= H_diff < x_skip.shape[1] and 0 <= W_diff < x_skip.shape[2]
    x_skip = jnp.pad(x_skip, ((0, 0), (0, H_diff), (0, W_diff), (0, 0)), mode="reflect")

    # --- conv1 on the "concat" of (y, skip); concat + halo built in VMEM ---
    c1 = params["conv1"]
    Cout = c1["w"].shape[-1]
    y1, s1, ss1 = conv1_fused(y, x_skip,
                              c1["w"].astype(jnp.bfloat16),
                              c1["b"].reshape(1, Cout).astype(jnp.float32), d=d)
    scale1, shift1 = bn_scale_shift(s1, ss1, c1["gamma"], c1["beta"], float(N * H * W))

    # --- conv2, with conv1's BN affine fused into its (in-VMEM-padded) input ---
    c2 = params["conv2"]
    y2, s2, ss2 = conv2_fused(y1, scale1, shift1,
                              c2["w"].astype(jnp.bfloat16),
                              c2["b"].reshape(1, Cout).astype(jnp.float32), d=d)
    scale2, shift2 = bn_scale_shift(s2, ss2, c2["gamma"], c2["beta"], float(N * H * W))

    # conv2's BN applied in plain jnp so XLA fuses it with the final NCHW transpose.
    z = y2 * scale2 + shift2
    return jnp.transpose(z, (0, 3, 1, 2))                               # NHWC -> NCHW


# ----------------------------------------------------------------------------
# Deterministic parameter init (synthetic; weight layouts chosen for NHWC kernels)
# ----------------------------------------------------------------------------
def init_params(key, in_channel, out_channel):
    c_half = in_channel // 2
    c1_in = c_half + out_channel
    ks = jax.random.split(key, 10)

    def conv_block_params(kw, kb, kg, kbeta, cin, cout):
        return {
            "w": 0.1 * jax.random.normal(kw, (3, 3, cin, cout), jnp.float32),
            "b": 0.1 * jax.random.normal(kb, (cout,), jnp.float32),
            "gamma": 1.0 + 0.1 * jax.random.normal(kg, (cout,), jnp.float32),
            "beta": 0.1 * jax.random.normal(kbeta, (cout,), jnp.float32),
        }

    return {
        "up_w": 0.1 * jax.random.normal(ks[0], (in_channel, c_half, 2, 2), jnp.float32),
        "up_b": 0.1 * jax.random.normal(ks[1], (c_half,), jnp.float32),
        "conv1": conv_block_params(ks[2], ks[3], ks[4], ks[5], c1_in, out_channel),
        "conv2": conv_block_params(ks[6], ks[7], ks[8], ks[9], out_channel, out_channel),
    }


if __name__ == "__main__":
    key = jax.random.PRNGKey(0)
    kp, kx, ksk = jax.random.split(key, 3)

    in_channel, out_channel = 8, 4
    params = init_params(kp, in_channel, out_channel)

    # x: low-res feature map; x_skip: encoder skip at 2x spatial resolution.
    x = jax.random.normal(kx, (2, in_channel, 8, 8), jnp.float32)
    x_skip = jax.random.normal(ksk, (2, out_channel, 16, 16), jnp.float32)

    out = conv_up_block_forward(params, x, x_skip, dilation=1)
    out = jax.block_until_ready(out)
    assert out.shape == (2, out_channel, 16, 16), out.shape
    assert jnp.all(jnp.isfinite(out))
    print("KERNEL_OK")
</pallas_src>

<mosaic_0001>
module attributes {stable_mosaic.version = 11 : i64} {
  func.func @_upconv_kernel(%arg0: i32, %arg1: memref<1x8x8x8xbf16, #tpu.memory_space<vmem>>, %arg2: memref<8x16xbf16, #tpu.memory_space<vmem>>, %arg3: memref<1x16xf32, #tpu.memory_space<vmem>>, %arg4: memref<1x8x2x8x8xbf16, #tpu.memory_space<vmem>>) attributes {dimension_semantics = [#tpu.dimension_semantics<parallel>], iteration_bounds = array<i64: 2>, scalar_prefetch = 0 : i64, scratch_operands = 0 : i64, tpu.core_type = #tpu.core_type<tc>, window_params = [{transform_indices = @transform_0, window_bounds = array<i64: 1, 8, 8, 8>}, {pipeline_mode = #tpu.pipeline_mode<synchronous>, transform_indices = @transform_1, window_bounds = array<i64: 8, 16>}, {pipeline_mode = #tpu.pipeline_mode<synchronous>, transform_indices = @transform_2, window_bounds = array<i64: 1, 16>}, {transform_indices = @transform_3, window_bounds = array<i64: 1, 8, 2, 8, 8>}]} {
    %c0 = arith.constant 0 : index
    %c0_0 = arith.constant 0 : index
    %c0_1 = arith.constant 0 : index
    %c0_2 = arith.constant 0 : index
    %0 = vector.load %arg1[%c0, %c0_0, %c0_1, %c0_2] : memref<1x8x8x8xbf16, #tpu.memory_space<vmem>>, vector<1x8x8x8xbf16>
    %1 = vector.shape_cast %0 : vector<1x8x8x8xbf16> to vector<8x8x8xbf16>
    %2 = vector.shape_cast %1 : vector<8x8x8xbf16> to vector<64x8xbf16>
    %c0_3 = arith.constant 0 : index
    %c0_4 = arith.constant 0 : index
    %3 = vector.load %arg2[%c0_3, %c0_4] : memref<8x16xbf16, #tpu.memory_space<vmem>>, vector<8x16xbf16>
    %cst = arith.constant dense<0.000000e+00> : vector<64x16xf32>
    %4 = tpu.matmul %2, %3, %cst {dimension_numbers = #tpu.dot_dimension_numbers<[1], [0], [0], [1], [0, 0, 1, 1], [], []>} : vector<64x8xbf16>, vector<8x16xbf16>, vector<64x16xf32> -> vector<64x16xf32>
    %c0_5 = arith.constant 0 : index
    %c0_6 = arith.constant 0 : index
    %5 = vector.load %arg3[%c0_5, %c0_6] : memref<1x16xf32, #tpu.memory_space<vmem>>, vector<1x16xf32>
    %6 = vector.broadcast %5 : vector<1x16xf32> to vector<64x16xf32>
    %7 = arith.addf %4, %6 : vector<64x16xf32>
    %8 = vector.extract_strided_slice %7 {offsets = [0, 0], sizes = [64, 8], strides = [1, 1]} : vector<64x16xf32> to vector<64x8xf32>
    %9 = vector.shape_cast %8 : vector<64x8xf32> to vector<8x1x8x8xf32>
    %10 = arith.truncf %9 : vector<8x1x8x8xf32> to vector<8x1x8x8xbf16>
    %c0_7 = arith.constant 0 : index
    %c0_8 = arith.constant 0 : index
    %c0_9 = arith.constant 0 : index
    %c0_10 = arith.constant 0 : index
    %c0_11 = arith.constant 0 : index
    %11 = vector.load %arg4[%c0_7, %c0_8, %c0_9, %c0_10, %c0_11] : memref<1x8x2x8x8xbf16, #tpu.memory_space<vmem>>, vector<1x8x1x8x8xbf16>
    %12 = vector.shape_cast %11 : vector<1x8x1x8x8xbf16> to vector<8x1x8x8xbf16>
    %13 = vector.shape_cast %10 : vector<8x1x8x8xbf16> to vector<1x8x1x8x8xbf16>
    tpu.vector_store %arg4[%c0_7, %c0_8, %c0_9, %c0_10, %c0_11], %13 {strides = array<i32>} : memref<1x8x2x8x8xbf16, #tpu.memory_space<vmem>>, vector<1x8x1x8x8xbf16>,
    %14 = vector.extract_strided_slice %7 {offsets = [0, 8], sizes = [64, 8], strides = [1, 1]} : vector<64x16xf32> to vector<64x8xf32>
    %15 = vector.shape_cast %14 : vector<64x8xf32> to vector<8x1x8x8xf32>
    %16 = arith.truncf %15 : vector<8x1x8x8xf32> to vector<8x1x8x8xbf16>
    %c0_12 = arith.constant 0 : index
    %c0_13 = arith.constant 0 : index
    %c1 = arith.constant 1 : index
    %c0_14 = arith.constant 0 : index
    %c0_15 = arith.constant 0 : index
    %17 = vector.load %arg4[%c0_12, %c0_13, %c1, %c0_14, %c0_15] : memref<1x8x2x8x8xbf16, #tpu.memory_space<vmem>>, vector<1x8x1x8x8xbf16>
    %18 = vector.shape_cast %17 : vector<1x8x1x8x8xbf16> to vector<8x1x8x8xbf16>
    %19 = vector.shape_cast %16 : vector<8x1x8x8xbf16> to vector<1x8x1x8x8xbf16>
    tpu.vector_store %arg4[%c0_12, %c0_13, %c1, %c0_14, %c0_15], %19 {strides = array<i32>} : memref<1x8x2x8x8xbf16, #tpu.memory_space<vmem>>, vector<1x8x1x8x8xbf16>,
    return
  }
  func.func @transform_0(%arg0: i32) -> (i32, i32, i32, i32) {
    %c0_i32 = arith.constant 0 : i32
    %c0_i32_0 = arith.constant 0 : i32
    %c0_i32_1 = arith.constant 0 : i32
    %c0_i32_2 = arith.constant 0 : i32
    return %arg0, %c0_i32, %c0_i32_0, %c0_i32_1 : i32, i32, i32, i32
  }
  func.func @transform_1(%arg0: i32) -> (i32, i32) {
    %c0_i32 = arith.constant 0 : i32
    %c0_i32_0 = arith.constant 0 : i32
    %c0_i32_1 = arith.constant 0 : i32
    return %c0_i32, %c0_i32_0 : i32, i32
  }
  func.func @transform_2(%arg0: i32) -> (i32, i32) {
    %c0_i32 = arith.constant 0 : i32
    %c0_i32_0 = arith.constant 0 : i32
    %c0_i32_1 = arith.constant 0 : i32
    return %c0_i32, %c0_i32_0 : i32, i32
  }
  func.func @transform_3(%arg0: i32) -> (i32, i32, i32, i32, i32) {
    %c0_i32 = arith.constant 0 : i32
    %c0_i32_0 = arith.constant 0 : i32
    %c0_i32_1 = arith.constant 0 : i32
    %c0_i32_2 = arith.constant 0 : i32
    %c0_i32_3 = arith.constant 0 : i32
    return %arg0, %c0_i32, %c0_i32_0, %c0_i32_1, %c0_i32_2 : i32, i32, i32, i32, i32
  }
}

</mosaic_0001>

<bundles_post_ra>
// kernel: tpu_custom_call.1
= control target key start
LH: loop header
LB: loop body
LE: loop exit
PB: predicated region body
PF: predicated region fallthrough
CT: control target
= control target key end

     0   :  { %8 = vsyncpa [#allocation3], 0  ;;  %s1023_s0 = inlined_call_operand.hbm [shape: bf16[2,8,8,8], index: 0, kind: input, shape index: {}]   ;;  %s1024_s1 = inlined_call_operand.hbm [shape: bf16[8,16], index: 1, kind: input, shape index: {}]   ;;  %s1025_s2 = inlined_call_operand.vmem [shape: f32[1,16], index: 2, kind: input, shape index: {}]   ;;  %s1026_s3 = inlined_call_operand.hbm [shape: bf16[2,8,2,8,8], index: 3, kind: output, shape index: {}]  }
   0x1   :  { %10 = vsyncpa [#allocation3 + $0x1], 0 }
   0x2   :  { %11 = vsyncpa [#allocation6], 0 }
   0x3   :  { %12 = vsyncpa [#allocation4], 0 }
   0x4   :  { %14 = vsyncpa [#allocation4 + $0x1], 0  ;;  %s786_s12 = smov 0   ;;  %s788_s13 = smov 0  }
   0x5   :  { %s790_s14 = smov 0   ;;  %s792_s15 = smov 0  }
   0x6 LB: > { %s807_s16 = sadd.s32 4294967295, %s756_s15   ;;  %s492_s17 = sadd.s32 4294967294, %s756_s15   ;;  %s756_s15 = sphi %s792_s15, %s1051_s15   ;;  %s752_s14 = sphi %s790_s14, %s1050_s14   ;;  %s748_s13 = sphi %s788_s13, %s1049_s13   ;;  %s744_s12 = sphi %s786_s12, %s1048_s12  }
   0x7   : > { %s811_s18 = sadd.s32 1, %s756_s15   ;;  %s27_s19 = sadd.s32 1, %s752_s14 }
   0x8   : > { %s24_s20 = ssub.s32 %s756_s15, %s811_s18  ;;  %p34_p0 = scmp.ne.s32.totalorder %s752_s14, %s748_s13 }
   0x9   : > { %p25_p1 = scmp.eq.s32.totalorder %s24_s20, 0  ;;  %p35_p2 = scmp.eq.s32.totalorder %s756_s15, 0 }
   0xa   : > { %p40_p3 = scmp.ne.s32.totalorder %s748_s13, %s744_s12  ;;  %p1027_p4 = scmp.eq.s32.totalorder %s807_s16, 0 }
   0xb   : > { %s823_s21 = scalar_select %p25_p1, %s752_s14, %s27_s19  }
   0xc   : > { %p825_p5 = por %p35_p2, %p34_p0  ;;  %p831_p6 = por %p1027_p4, %p40_p3 }
   0xd   : > { %p106_p7 = scmp.eq.s32.totalorder %s807_s16, 1  ;;  %p112_p8 = scmp.eq.s32.totalorder %s492_s17, 1 }
   0xe   : > { %s1033_s23 = scalar_select %p831_p6, 1, 0 }
   0xf   : > { %p493_p9 = scmp.ge.s32.totalorder %s756_s15, 1  ;;  %p119_p10 = scmp.lt.s32.totalorder %s756_s15, 3 }
  0x10   : > { %p838_p11 = por %p106_p7, %p34_p0  ;;  %p842_p12 = por %p112_p8, %p40_p3 }
  0x11   : > { %p846_p13 = pnand %p493_p9, %p119_p10  ;;  %s758_s27 = smov [#allocation5]  }
  0x12   : > { %s1034_s24 = scalar_select %p838_p11, 1, 0 }
  0x13   : > { %s1035_s25 = scalar_select %p842_p12, 1, 0 }
  0x14   : > { %s1036_s26 = scalar_select %p846_p13, 1, 0 }
  0x15   : > { %p570_p2 = pneg %p846_p13  ;;  %s132_s28 = sshll.u32 %s758_s27, 4  ;;  %s133_s28 = int_to_ptr.vmem [resolvable:$true] %s132_s28 }
  0x16   : > { %p583_p4 = scmp.lt.s32.totalorder %s756_s15, 2  ;;  %p1037_p0 = scmp.eq.s32.totalorder %s807_s16, 0 }
  0x17   : > { %s146_s30 = sand.u32 1, %s752_s14   ;;  %s628_s8 = scalar_lea.hbm %s1024_s1, 64 }
  0x18   : > { %p856_p7 = pnand %p570_p2, %p1037_p0  ;;  %p863_p3 = pnand %p583_p4, %p825_p5 }
  0x19   : > { %s496_s5 = sshll.u32 %s146_s30, 5  ;;  %p629_p8 = scmp.ne.s32.totalorder %s1024_s1, %s628_s8 }
  0x1a   : > { %s1039_s4 = scalar_select %p863_p3, 1, 0 }
  0x1b   : > { %p630_p9 = pneg %p856_p7  ;;  %p635_p4 = scmp.lt.u32.totalorder %s628_s8, %s1024_s1 }
  0x1d   : > { %p631_p10 = pnand %p630_p9, %p629_p8 }
  0x1f   : > { %p632_p2 = pneg %p631_p10 }
  0x21   : > { %p637_p5 = pnand %p635_p4, %p632_p2 }
  0x23   : > { %640 = shalt.err (!%p637_p5)
}
  0x24   : > { %s641_s19 = scalar_lea.vmem %s133_s28, 64  ;;  %p649_p11 = scmp.lt.s32.totalorder %s133_s28, %s133_s28 }
  0x25   : > { %p642_p0 = scmp.ne.s32.totalorder %s133_s28, %s641_s19  ;;  %p650_p6 = scmp.lt.s32.totalorder %s641_s19, %s641_s19 }
  0x27   : > { %p644_p1 = pnand %p642_p0, %p630_p9  ;;  %p651_p13 = por %p650_p6, %p649_p11 }
  0x29   : > { %p645_p12 = pneg %p644_p1 }
  0x2b   : > { %p652_p3 = pnand %p651_p13, %p645_p12 }
  0x2d   : > { %655 = shalt.err (!%p652_p3)
}
  0x2e   : > { %573 = dma.hbm_to_vmem [thread:$0]  (!%p856_p7), %s1024_s1, 64, %s133_s28, [#allocation6]  }
  0x2f   : > { %s533_s27 = sshll.u32 %s756_s15, 9  ;;  %s150_s6 = scalar_lea.vmem [#allocation2], %s496_s5 }
  0x30   : > { %s157_s7 = sshll.u32 %s150_s6, 4  ;;  %s887_s10 = scalar_lea.hbm %s1023_s0, %s533_s27  ;;  %s889_s7 = int_to_ptr.vmem [resolvable:$true] %s157_s7 }
  0x31   : > { %s891_s29 = scalar_lea.sflag [#allocation3], %s146_s30  ;;  %s656_s11 = scalar_lea.hbm %s887_s10, 512 }
  0x32   : > { %p657_p6 = scmp.ne.s32.totalorder %s887_s10, %s656_s11  ;;  %p1040_p11 = scmp.ne.s32.totalorder %s1039_s4, 0 }
  0x33   : > { %s661_s17 = scalar_lea.hbm %s1023_s0, 1024  ;;  %p662_p7 = scmp.lt.u32.totalorder %s887_s10, %s1023_s0 }
  0x34   : > { %p658_p12 = pneg %p1040_p11  ;;  %p663_p3 = scmp.lt.u32.totalorder %s661_s17, %s656_s11 }
  0x35   : > { %p665_p9 = scmp.lt.u32.totalorder %s656_s11, %s887_s10 }
  0x36   : > { %p659_p13 = pnand %p658_p12, %p657_p6  ;;  %p664_p8 = por %p663_p3, %p662_p7 }
  0x38   : > { %p660_p1 = pneg %p659_p13  ;;  %p666_p10 = por %p665_p9, %p664_p8 }
  0x3a   : > { %p667_p2 = pnand %p666_p10, %p660_p1 }
  0x3c   : > { %670 = shalt.err (!%p667_p2)
}
  0x3d   : > { %s671_s30 = scalar_lea.vmem %s889_s7, 512  ;;  %s759_s22 = smov [#allocation2]  }
  0x3e   : > { %p672_p4 = scmp.ne.s32.totalorder %s889_s7, %s671_s30  ;;  %s676_s27 = sshll.u32 %s759_s22, 4  ;;  %s677_s27 = int_to_ptr.vmem [resolvable:$false] %s676_s27 }
  0x3f   : > { %s678_s6 = scalar_lea.vmem %s677_s27, 1024  ;;  %p679_p6 = scmp.lt.s32.totalorder %s889_s7, %s677_s27 }
  0x40   : > { %p674_p5 = pnand %p672_p4, %p658_p12  ;;  %p680_p13 = scmp.lt.s32.totalorder %s678_s6, %s671_s30 }
  0x42   : > { %p675_p0 = pneg %p674_p5  ;;  %p681_p7 = por %p680_p13, %p679_p6 }
  0x44   : > { %p682_p3 = pnand %p681_p7, %p675_p0 }
  0x46   : > { %685 = shalt.err (!%p682_p3)
}
  0x47   : > { %s760_s8 = smov 64   ;;  %s761_s9 = smov 4  }
  0x48   : > { %577 = dma.hbm_to_vmem [thread:$0]  (!%p1040_p11), %s887_s10, 512, %s889_s7, %s891_s29, %s760_s8, %s760_s8, %s761_s9  }
  0x49   : > { %p1041_p12 = scmp.ne.s32.totalorder %s1036_s26, 0 }
  0x4a   : > { %s922_s11 = sand.u32 (!%p1041_p12), 1, %s748_s13   ;;  %p1042_p1 = scmp.ne.s32.totalorder (!%p1041_p12), %s1033_s23, 0 }
  0x4b   : > { %169 = sbr.rel (%p1041_p12) target bundleno = 450 (0x1c2), region = 32  ;;  %s500_s28 = sshll.u32 (!%p1041_p12), %s922_s11, 5 }
  0x4c   : > { %s172_s5 = scalar_lea.sflag (!%p1041_p12), [#allocation3], %s922_s11  ;;  %s175_s17 = scalar_lea.vmem (!%p1041_p12), [#allocation2], %s500_s28 }
  0x52   : > { %731 = dma.done.wait (%p1042_p1), %s172_s5, 512  }
  0x53   : > { %733 = vsyncadd (%p1042_p1), %s172_s5, 4294966784  ;;  %p1043_p8 = scmp.eq.s32.totalorder %s807_s16, 0 }
  0x55   : > { %735 = dma.done.wait (%p1043_p8), [#allocation6], 64   ;;  %p1044_p11 = pmov %p1043_p8 }
  0x56   : > { %vm252_vm0 = vcmask 1043456   ;;  %vm239_vm1 = vcmask 64512   ;;  %v211_v0 = vld [vmem:[#allocation5] sm:$0xf]  ;;  %v625_v3 = vld [vmem:[%s175_s17 + $0x8] sm:$0xff]   ;;  %v626_v4 = vld [vmem:[%s175_s17 + $0x10] sm:$0xff]  }
  0x57   : > { %737 = vsyncadd (%p1044_p11), [#allocation6], 4294967232  ;;  %560 = vmatprep.subr.msk.bf16.mxu0 %vm252_vm0, %v211_v0  ;;  %561 = vmatprep.subr.msk.bf16.mxu1 %vm252_vm0, %v211_v0  ;;  %v254_v1 = vsel %vm252_vm0, %v211_v0, 0  ;;  %v624_v2 = vld [vmem:[%s175_s17] sm:$0xff]   ;;  %v627_v5 = vld [vmem:[%s175_s17 + $0x18] sm:$0xff]   ;;  %s502_s4 = sshll.u32 %s922_s11, 6 }
  0x58   : > { %549 = vmatpush3.bf16.msra.mxu0 %v254_v1  ;;  %559 = vmatpush3.bf16.msra.mxu1 %v254_v1  ;;  %v503_v6 = vld [vmem:[%s1025_s2] ss:$0 sm:$0xff]  ;;  %vm329_vm2 = vcmask 60416   ;;  %s938_s7 = scalar_lea.vmem [#allocation7], %s502_s4  ;;  %s762_s10 = smov 120  }
  0x59   : > { %550 = vmatprep.mubr.msk.bf16.mxu0 %vm239_vm1, %v624_v2  ;;  %554 = vmatprep.mubr.msk.bf16.mxu1 %vm239_vm1, %v626_v4  ;;  %s542_s29 = sshll.u32 %s807_s16, 10  ;;  %s409_s19 = sshll.u32 %s938_s7, 4  ;;  %s975_s19 = int_to_ptr.vmem [resolvable:$true] %s409_s19 }
  0x5a   : > { %s973_s22 = scalar_lea.hbm %s1026_s3, %s542_s29  ;;  %s396_s16 = scalar_lea.sflag [#allocation4], %s922_s11 }
  0x5b   : > { %551 = vmatmul.mubr.msk.bf16.vlgmr.msra.gmra.mrb[0].mxu0 %vm239_vm1, %v625_v3  ;;  %555 = vmatmul.mubr.msk.bf16.vlgmr.msra.gmra.mrb[0].mxu1 %vm239_vm1, %v627_v5  ;;  %s686_s27 = scalar_lea.vmem %s975_s19, 1024  ;;  %p1045_p10 = scmp.ne.s32.totalorder %s1034_s24, 0 }
  0x5c   : > { %p687_p9 = scmp.ne.s32.totalorder %s975_s19, %s686_s27  ;;  %s763_s6 = smov [#allocation7]  }
  0x5d   : > { %s690_s8 = sshll.u32 %s763_s6, 4  ;;  %s691_s8 = int_to_ptr.vmem [resolvable:$false] %s690_s8 }
  0x5e   : > { %p688_p2 = pnand %p687_p9, %p1045_p10  ;;  %s692_s9 = scalar_lea.vmem %s691_s8, 2048 }
  0x5f   : > { %p693_p5 = scmp.lt.s32.totalorder %s975_s19, %s691_s8  ;;  %p694_p0 = scmp.lt.s32.totalorder %s692_s9, %s686_s27 }
  0x60   : > { %p689_p4 = pneg %p688_p2 }
  0x61   : > { %p695_p6 = por %p694_p0, %p693_p5 }
  0x63   : > { %p696_p13 = pnand %p695_p6, %p689_p4 }
 0x12e   : > { %v552_v7 = vpop.f32.mrb[0].mxu0  ;;  %v556_v10 = vpop.f32.mrb[0].mxu1 }
 0x12f   : > { %v299_v8 = vadd.f32 %v552_v7, %v503_v6  ;;  %v290_v9 = vpop.f32.mrb[1].mxu0  ;;  %v315_v12 = vadd.f32 %v556_v10, %v503_v6  ;;  %v306_v14 = vpop.f32.mrb[1].mxu1 }
 0x130   : > { %v291_v11 = vadd.f32 %v503_v6, %v290_v9  ;;  %v553_v13 = vpop.f32.mrb[2].mxu0  ;;  %v307_v17 = vadd.f32 %v503_v6, %v306_v14  ;;  %v557_v19 = vpop.f32.mrb[2].mxu1 }
 0x131   : > { %v323_v15 = vpack.c.bf16 %v299_v8, %v299_v8  ;;  %v302_v16 = vadd.f32 %v553_v13, %v503_v6  ;;  %v293_v18 = vpop.f32.mrb[3].mxu0  ;;  %v327_v21 = vpack.c.bf16 %v315_v12, %v315_v12  ;;  %v318_v23 = vadd.f32 %v557_v19, %v503_v6  ;;  %v309_v24 = vpop.f32.mrb[3].mxu1 }
 0x132   : > { %v321_v20 = vpack.c.bf16 %v291_v11, %v291_v11  ;;  %v294_v22 = vadd.f32 %v503_v6, %v293_v18  ;;  %v325_v26 = vpack.c.bf16 %v307_v17, %v307_v17  ;;  %v310_v27 = vadd.f32 %v503_v6, %v309_v24 }
 0x133   : > { %332 = vst.msk [vmem:[%s938_s7 + $0x10] sm:$0xf] %vm329_vm2, %v323_v15  ;;  %v324_v25 = vpack.c.bf16 %v302_v16, %v302_v16  ;;  %366 = vrot.lane.b32.xlu1 %v323_v15, %s762_s10  ;;  %336 = vst.msk [vmem:[%s938_s7 + $0x30] sm:$0xf] %vm329_vm2, %v327_v21  ;;  %v328_v29 = vpack.c.bf16 %v318_v23, %v318_v23 }
 0x134   : > { %330 = vst.msk [vmem:[%s938_s7] sm:$0xf] %vm329_vm2, %v321_v20  ;;  %v322_v28 = vpack.c.bf16 %v294_v22, %v294_v22  ;;  %362 = vrot.lane.b32.xlu0 %v321_v20, %s762_s10  ;;  %334 = vst.msk [vmem:[%s938_s7 + $0x20] sm:$0xf] %vm329_vm2, %v325_v26  ;;  %v326_v30 = vpack.c.bf16 %v310_v27, %v310_v27 }
 0x135   : > { %333 = vst.msk [vmem:[%s938_s7 + $0x18] sm:$0xf] %vm329_vm2, %v324_v25  ;;  %337 = vst.msk [vmem:[%s938_s7 + $0x38] sm:$0xf] %vm329_vm2, %v328_v29 }
 0x136   : > { %331 = vst.msk [vmem:[%s938_s7 + $0x8] sm:$0xf] %vm329_vm2, %v322_v28  ;;  %335 = vst.msk [vmem:[%s938_s7 + $0x28] sm:$0xf] %vm329_vm2, %v326_v30 }
 0x137   : > { %368 = vrot.lane.b32.xlu1 %v324_v25, %s762_s10 }
 0x138   : > { %370 = vrot.lane.b32.xlu0 %v325_v26, %s762_s10 }
 0x13b   : > { %372 = vrot.lane.b32.xlu1 %v326_v30, %s762_s10 }
 0x13c   : > { %364 = vrot.lane.b32.xlu0 %v322_v28, %s762_s10 }
 0x13f   : > { %376 = vrot.lane.b32.xlu1 %v328_v29, %s762_s10 }
 0x140   : > { %374 = vrot.lane.b32.xlu0 %v327_v21, %s762_s10 }
 0x1a5   : > { %v367_v31 = vpop.permute.xlu1 %366 }
 0x1a6   : > { %522 = vst.msk [vmem:[%s938_s7 + $0x14] sm:$0xf] %vm329_vm2, %v367_v31  ;;  %v363_v32 = vpop.permute.xlu0 %362 }
 0x1a7   : > { %520 = vst.msk [vmem:[%s938_s7 + $0x4] sm:$0xf] %vm329_vm2, %v363_v32 }
 0x1a9   : > { %v369_v33 = vpop.permute.xlu1 %368 }
 0x1aa   : > { %523 = vst.msk [vmem:[%s938_s7 + $0x1c] sm:$0xf] %vm329_vm2, %v369_v33  ;;  %v371_v34 = vpop.permute.xlu0 %370 }
 0x1ab   : > { %524 = vst.msk [vmem:[%s938_s7 + $0x24] sm:$0xf] %vm329_vm2, %v371_v34 }
 0x1ad   : > { %v373_v35 = vpop.permute.xlu1 %372 }
 0x1ae   : > { %525 = vst.msk [vmem:[%s938_s7 + $0x2c] sm:$0xf] %vm329_vm2, %v373_v35  ;;  %v365_v36 = vpop.permute.xlu0 %364 }
 0x1af   : > { %521 = vst.msk [vmem:[%s938_s7 + $0xc] sm:$0xf] %vm329_vm2, %v365_v36 }
 0x1b1   : > { %v377_v37 = vpop.permute.xlu1 %376 }
 0x1b2   : > { %527 = vst.msk [vmem:[%s938_s7 + $0x3c] sm:$0xf] %vm329_vm2, %v377_v37  ;;  %v375_v38 = vpop.permute.xlu0 %374 }
 0x1b3   : > { %526 = vst.msk [vmem:[%s938_s7 + $0x34] sm:$0xf] %vm329_vm2, %v375_v38 }
 0x1b4   : > { %699 = shalt.err (!%p696_p13)
}
 0x1b5   : > { %s700_s28 = scalar_lea.hbm %s973_s22, 1024  ;;  %s704_s23 = scalar_lea.hbm %s1026_s3, 2048 }
 0x1b6   : > { %p701_p7 = scmp.ne.s32.totalorder %s973_s22, %s700_s28  ;;  %p705_p1 = scmp.lt.u32.totalorder %s973_s22, %s1026_s3 }
 0x1b7   : > { %p706_p8 = scmp.lt.u32.totalorder %s704_s23, %s700_s28  ;;  %p708_p9 = scmp.lt.u32.totalorder %s700_s28, %s973_s22 }
 0x1b8   : > { %p702_p3 = pnand %p701_p7, %p1045_p10 }
 0x1b9   : > { %p707_p11 = por %p706_p8, %p705_p1 }
 0x1ba   : > { %p703_p12 = pneg %p702_p3 }
 0x1bb   : > { %p709_p2 = por %p708_p9, %p707_p11 }
 0x1bd   : > { %p710_p4 = pnand %p709_p2, %p703_p12 }
 0x1bf   : > { %713 = shalt.err (!%p710_p4)
}
 0x1c0   : > { %s764_s7 = smov 64   ;;  %s765_s10 = smov 4  }
 0x1c1   : > { %568 = dma.vmem_to_hbm [thread:$0]  (%p1045_p10), %s975_s19, 1024, %s973_s22, %s396_s16, %s764_s7, %s764_s7, %s765_s10  }
 0x1c2 PF: > { %s424_s29 = sand.u32 1, %s744_s12   ;;  %p1046_p5 = scmp.ne.s32.totalorder %s1035_s25, 0 }
 0x1c3   : > { %p1047_p0 = scmp.ge.s32.totalorder %s756_s15, 2  ;;  %s425_s20 = scalar_lea.sflag [#allocation4], %s424_s29 }
 0x1c5   : > { %p579_p6 = pnand %p1047_p0, %p1046_p5 }
 0x1c7   : > { %739 = dma.done.wait (!%p579_p6), %s425_s20, 1024  }
 0x1c8   : > { %741 = vsyncadd (!%p579_p6), %s425_s20, 4294966272  ;;  %p17_p13 = scmp.ge.s32.totalorder %s811_s18, 4   ;;  %s1048_s12 = smov %s748_s13 }
 0x1c9   : > { %s1049_s13 = smov %s752_s14  ;;  %s1050_s14 = smov %s823_s21 }
 0x1ca   : > { %s1051_s15 = smov %s811_s18  ;;  %19 = sbr.rel (!%p17_p13) target bundleno = 6 (0x6), region = 82 }
 0x1d1   :  { %430 = vsyncpa [#allocation3], 1 }
 0x1d2   :  { %432 = vsyncpa [#allocation3 + $0x1], 1 }
 0x1d3   :  { %433 = vsyncpa [#allocation6], 1 }
 0x1d4   :  { %434 = vsyncpa [#allocation4], 1 }
 0x1d5   :  { %436 = vsyncpa [#allocation4 + $0x1], 1 }

</bundles_post_ra>
